<compile_context>
chip_gen: v5e
topology: v5e:2x2
jax: 0.10.0
libtpu: 0.0.40
codegen_flags: <defaults>
</compile_context>

<pallas_src>
import functools

import jax
import jax.numpy as jnp
from jax.experimental import pallas as pl
from jax.experimental.pallas import tpu as pltpu

_INV_SQRT2 = 0.7071067811865476
_SQRT_2_OVER_PI = 0.7978845608028654


def strip_mlp_kernel(x_ref, mask_ref, w1_ref, b1_ref, wdw_ref, bdw_ref,
                     w2_ref, b2_ref, o_ref, acc_ref, *, W, approx_gelu):
    """Grid = (batch, Chid-tile). Operates on lane-dense (C, HWp) slabs."""
    c = pl.program_id(1)
    HWp = x_ref.shape[-1]

    # ---- fc1: 1x1 conv == (TC, Cin) @ (Cin, HWp) on the MXU (bf16 in, f32 acc)
    x = x_ref[0]                                                     # (Cin, HWp)
    h = jnp.dot(w1_ref[...], x,
                preferred_element_type=jnp.float32) + b1_ref[...]   # (TC, HWp) f32

    # ---- depthwise 3x3 conv, stride 1, padding 1, in flattened layout -------
    m = mask_ref[...]                                                # (4, HWp) f32 0/1
    not_left, not_right = m[0:1], m[1:2]
    not_top, not_bottom = m[2:3], m[3:4]

    # Row neighbours first (2 rolls), then column rolls inside the static loop
    # (2 per row) -> 8 XLU rolls total, fewer live full-size temporaries.
    h_up = pltpu.roll(h, W, axis=1) * not_top                        # row i-1 (dy=0)
    h_dn = pltpu.roll(h, HWp - W, axis=1) * not_bottom               # row i+1 (dy=2)

    wdw = wdw_ref[...]                                               # (TC, 9), resident
    rows = (h_up, h, h_dn)
    dw = None
    for dy in range(3):                                              # static unroll
        hr = rows[dy]
        left = pltpu.roll(hr, 1, axis=1) * not_left                  # col j-1 (dx=0)
        right = pltpu.roll(hr, HWp - 1, axis=1) * not_right          # col j+1 (dx=2)
        t = (left * wdw[:, 3 * dy:3 * dy + 1]
             + hr * wdw[:, 3 * dy + 1:3 * dy + 2]
             + right * wdw[:, 3 * dy + 2:3 * dy + 3])
        dw = t if dw is None else dw + t
    dw = dw + bdw_ref[...]                                           # (TC, HWp) f32

    # ---- GELU ----------------------------------------------------------------
    if approx_gelu:
        # tanh approximation: transcendental goes to the EUP (free slot when the
        # VALU is the binding unit).  Slightly off torch's exact default.
        a = 0.5 * dw * (1.0 + jnp.tanh(_SQRT_2_OVER_PI * (dw + 0.044715 * dw * dw * dw)))
    else:
        a = 0.5 * dw * (1.0 + jax.lax.erf(dw * jnp.float32(_INV_SQRT2)))

    # ---- fc2: 1x1 conv == (Cout, TC) @ (TC, HWp); f32 accumulation over Chid --
    contrib = jnp.dot(w2_ref[...], a.astype(w2_ref.dtype),
                      preferred_element_type=jnp.float32)            # (Cout, HWp) f32

    @pl.when(c == 0)
    def _():
        acc_ref[...] = contrib

    @pl.when(c > 0)
    def _():
        acc_ref[...] += contrib

    @pl.when(c == pl.num_programs(1) - 1)
    def _():
        o_ref[0] = (acc_ref[...] + b2_ref[...]).astype(o_ref.dtype)


def _pick_chid_tile(chid, max_tile=256):
    """Largest multiple-of-128 divisor of chid that is <= max_tile, else chid."""
    if chid <= max_tile:
        return chid
    t = (max_tile // 128) * 128
    while t >= 128:
        if chid % t == 0:
            return t
        t -= 128
    return chid   # no clean tile: fall back to whole-axis residency


def _vmem_limit_bytes():
    try:
        info = pltpu.get_tpu_info()
        return int(info.vmem_capacity_bytes * 3 // 4)
    except Exception:
        return 64 * 1024 * 1024


@functools.partial(jax.jit, static_argnames=("W", "approx_gelu"))
def _strip_mlp_flat(x_flat, edge_masks, w1, b1, wdw, bdw, w2, b2, W,
                    approx_gelu=False):
    N, Cin, HWp = x_flat.shape
    Chid = w1.shape[0]
    Cout = w2.shape[0]
    TC = _pick_chid_tile(Chid)
    n_ctiles = Chid // TC

    kernel = functools.partial(strip_mlp_kernel, W=W, approx_gelu=approx_gelu)
    return pl.pallas_call(
        kernel,
        out_shape=jax.ShapeDtypeStruct((N, Cout, HWp), x_flat.dtype),
        grid_spec=pltpu.PrefetchScalarGridSpec(
            num_scalar_prefetch=0,
            grid=(N, n_ctiles),
            in_specs=[
                pl.BlockSpec((1, Cin, HWp), lambda n, c: (n, 0, 0)),   # x
                pl.BlockSpec((4, HWp), lambda n, c: (0, 0)),           # border masks
                pl.BlockSpec((TC, Cin), lambda n, c: (c, 0)),          # w1 tile
                pl.BlockSpec((TC, 1), lambda n, c: (c, 0)),            # b1 tile
                pl.BlockSpec((TC, 9), lambda n, c: (c, 0)),            # dwconv w tile
                pl.BlockSpec((TC, 1), lambda n, c: (c, 0)),            # dwconv b tile
                pl.BlockSpec((Cout, TC), lambda n, c: (0, c)),         # w2 tile
                pl.BlockSpec((Cout, 1), lambda n, c: (0, 0)),          # b2
            ],
            out_specs=pl.BlockSpec((1, Cout, HWp), lambda n, c: (n, 0, 0)),
            scratch_shapes=[pltpu.VMEM((Cout, HWp), jnp.float32)],     # fc2 accumulator
        ),
        compiler_params=pltpu.CompilerParams(
            dimension_semantics=("parallel", "arbitrary"),
            vmem_limit_bytes=_vmem_limit_bytes()),
    )(x_flat, edge_masks, w1, b1, wdw, bdw, w2, b2)


def strip_mlp(x_nchw, params, *, use_bf16=True, approx_gelu=False):
    """Public entry point: NCHW in, NCHW out (matches the PyTorch module)."""
    w1, b1, wdw, bdw, w2, b2 = params
    N, Cin, H, W = x_nchw.shape
    Cout = w2.shape[0]
    HW = H * W
    HWp = ((HW + 127) // 128) * 128    # lane-dense last dim -> unmasked stores

    # Reshape only merges trailing dims (free); pad HW up to a lane multiple.
    x_flat = x_nchw.reshape(N, Cin, HW)
    if HWp != HW:
        x_flat = jnp.pad(x_flat, ((0, 0), (0, 0), (0, HWp - HW)))

    io_dtype = jnp.bfloat16 if use_bf16 else x_nchw.dtype
    x_flat = x_flat.astype(io_dtype)
    w1c = w1.astype(io_dtype)
    w2c = w2.astype(io_dtype)

    # Border masks (f32 0/1): neighbour-exists indicators, zeroed on padded
    # lanes so lane rolls never leak padded garbage into valid pixels.
    j = jnp.arange(HWp, dtype=jnp.int32)
    cols = j % W
    valid = j < HW
    edge_masks = jnp.stack([
        (cols != 0) & valid,          # has a left neighbour
        (cols != (W - 1)) & valid,    # has a right neighbour
        (j >= W) & valid,             # has a row above
        (j < (HW - W)) & valid,       # has a row below
    ]).astype(jnp.float32)            # (4, HWp)

    y_flat = _strip_mlp_flat(x_flat, edge_masks, w1c, b1, wdw, bdw, w2c, b2,
                             W=W, approx_gelu=approx_gelu)
    if HWp != HW:
        y_flat = y_flat[:, :, :HW]
    return y_flat.reshape(N, Cout, H, W).astype(x_nchw.dtype)


def ref_strip_mlp(x_nchw, params):
    """Pure-JAX f32 reference (NHWC path, same math, no Pallas) for validation."""
    w1, b1, wdw, bdw, w2, b2 = params
    x = jnp.transpose(x_nchw, (0, 2, 3, 1)).astype(jnp.float32)
    h = jnp.einsum('nhwc,dc->nhwd', x, w1) + b1[:, 0]
    N, H, W, Chid = h.shape
    hp = jnp.pad(h, ((0, 0), (1, 1), (1, 1), (0, 0)))
    dw = jnp.zeros_like(h) + bdw[:, 0]
    for k in range(9):
        dy, dx = k // 3, k % 3
        dw = dw + hp[:, dy:dy + H, dx:dx + W, :] * wdw[:, k]
    a = 0.5 * dw * (1.0 + jax.lax.erf(dw * jnp.float32(_INV_SQRT2)))
    out = jnp.einsum('nhwd,ed->nhwe', a, w2) + b2[:, 0]
    return jnp.transpose(out, (0, 3, 1, 2))


def init_params(key, c_in, c_hid, c_out):
    """Deterministic synthetic weights.
    PyTorch shapes -> kernel shapes:
      fc1.weight (Chid,Cin,1,1)  -> w1  (Chid,Cin)  = weight[:, :, 0, 0]
      fc1.bias   (Chid,)         -> b1  (Chid,1)
      dwconv.weight (Chid,1,3,3) -> wdw (Chid,9)    = weight.reshape(Chid, 9)
      dwconv.bias (Chid,)        -> bdw (Chid,1)
      fc2.weight (Cout,Chid,1,1) -> w2  (Cout,Chid) = weight[:, :, 0, 0]
      fc2.bias   (Cout,)         -> b2  (Cout,1)
    """
    ks = jax.random.split(key, 6)
    w1 = jax.random.normal(ks[0], (c_hid, c_in), jnp.float32) * 0.2
    b1 = jax.random.normal(ks[1], (c_hid, 1), jnp.float32) * 0.1
    wdw = jax.random.normal(ks[2], (c_hid, 9), jnp.float32) * 0.2
    bdw = jax.random.normal(ks[3], (c_hid, 1), jnp.float32) * 0.1
    w2 = jax.random.normal(ks[4], (c_out, c_hid), jnp.float32) * 0.2
    b2 = jax.random.normal(ks[5], (c_out, 1), jnp.float32) * 0.1
    return (w1, b1, wdw, bdw, w2, b2)


if __name__ == "__main__":
    key = jax.random.PRNGKey(0)
    k_x, k_p, k_x2 = jax.random.split(key, 3)

    N, C_IN, H, W = 2, 4, 16, 16          # NCHW, like the PyTorch module
    C_HID, C_OUT = 8, C_IN                # hidden_features=8, out_features=in
    params = init_params(k_p, C_IN, C_HID, C_OUT)

    # Case 1 (default fast path): bf16 I/O + bf16 MXU operands, lane-aligned HW.
    x = jax.random.normal(k_x, (N, C_IN, H, W), jnp.float32)
    y = jax.block_until_ready(strip_mlp(x, params))
    y_ref = ref_strip_mlp(x, params)
    assert y.shape == (N, C_OUT, H, W)
    assert jnp.allclose(y, y_ref, rtol=3e-2, atol=3e-2)

    # Case 2: full f32 path with a non-lane-aligned H*W (exercises padding +
    # border-mask handling of padded lanes), tight tolerance.
    H2, W2 = 10, 12
    x2 = jax.random.normal(k_x2, (N, C_IN, H2, W2), jnp.float32)
    y2 = jax.block_until_ready(strip_mlp(x2, params, use_bf16=False))
    y2_ref = ref_strip_mlp(x2, params)
    assert y2.shape == (N, C_OUT, H2, W2)
    assert jnp.allclose(y2, y2_ref, rtol=1e-4, atol=1e-4)

    print("KERNEL_OK")
</pallas_src>

<mosaic_0001>
module attributes {stable_mosaic.version = 11 : i64} {
  func.func @strip_mlp_kernel(%arg0: i32, %arg1: i32, %arg2: memref<1x4x256xbf16, #tpu.memory_space<vmem>>, %arg3: memref<4x256xf32, #tpu.memory_space<vmem>>, %arg4: memref<8x4xbf16, #tpu.memory_space<vmem>>, %arg5: memref<8x1xf32, #tpu.memory_space<vmem>>, %arg6: memref<8x9xf32, #tpu.memory_space<vmem>>, %arg7: memref<8x1xf32, #tpu.memory_space<vmem>>, %arg8: memref<4x8xbf16, #tpu.memory_space<vmem>>, %arg9: memref<4x1xf32, #tpu.memory_space<vmem>>, %arg10: memref<1x4x256xbf16, #tpu.memory_space<vmem>>, %arg11: memref<4x256xf32, #tpu.memory_space<vmem>>) attributes {dimension_semantics = [#tpu.dimension_semantics<parallel>, #tpu.dimension_semantics<arbitrary>], iteration_bounds = array<i64: 2, 1>, scalar_prefetch = 0 : i64, scratch_operands = 1 : i64, tpu.core_type = #tpu.core_type<tc>, window_params = [{transform_indices = @transform_0, window_bounds = array<i64: 1, 4, 256>}, {pipeline_mode = #tpu.pipeline_mode<synchronous>, transform_indices = @transform_1, window_bounds = array<i64: 4, 256>}, {transform_indices = @transform_2, window_bounds = array<i64: 8, 4>}, {transform_indices = @transform_3, window_bounds = array<i64: 8, 1>}, {transform_indices = @transform_4, window_bounds = array<i64: 8, 9>}, {transform_indices = @transform_5, window_bounds = array<i64: 8, 1>}, {transform_indices = @transform_6, window_bounds = array<i64: 4, 8>}, {pipeline_mode = #tpu.pipeline_mode<synchronous>, transform_indices = @transform_7, window_bounds = array<i64: 4, 1>}, {transform_indices = @transform_8, window_bounds = array<i64: 1, 4, 256>}]} {
    %c0 = arith.constant 0 : index
    %c0_0 = arith.constant 0 : index
    %c0_1 = arith.constant 0 : index
    %0 = vector.load %arg2[%c0, %c0_0, %c0_1] : memref<1x4x256xbf16, #tpu.memory_space<vmem>>, vector<1x4x256xbf16>
    %1 = vector.shape_cast %0 : vector<1x4x256xbf16> to vector<4x256xbf16>
    %c0_2 = arith.constant 0 : index
    %c0_3 = arith.constant 0 : index
    %2 = vector.load %arg4[%c0_2, %c0_3] : memref<8x4xbf16, #tpu.memory_space<vmem>>, vector<8x4xbf16>
    %cst = arith.constant dense<0.000000e+00> : vector<8x256xf32>
    %3 = tpu.matmul %2, %1, %cst {dimension_numbers = #tpu.dot_dimension_numbers<[1], [0], [0], [1], [0, 0, 1, 1], [], []>} : vector<8x4xbf16>, vector<4x256xbf16>, vector<8x256xf32> -> vector<8x256xf32>
    %c0_4 = arith.constant 0 : index
    %c0_5 = arith.constant 0 : index
    %4 = vector.load %arg5[%c0_4, %c0_5] : memref<8x1xf32, #tpu.memory_space<vmem>>, vector<8x1xf32>
    %5 = vector.broadcast %4 : vector<8x1xf32> to vector<8x256xf32>
    %6 = arith.addf %3, %5 : vector<8x256xf32>
    %c0_6 = arith.constant 0 : index
    %c0_7 = arith.constant 0 : index
    %7 = vector.load %arg3[%c0_6, %c0_7] : memref<4x256xf32, #tpu.memory_space<vmem>>, vector<4x256xf32>
    %8 = vector.extract_strided_slice %7 {offsets = [0, 0], sizes = [1, 256], strides = [1, 1]} : vector<4x256xf32> to vector<1x256xf32>
    %9 = vector.extract_strided_slice %7 {offsets = [1, 0], sizes = [1, 256], strides = [1, 1]} : vector<4x256xf32> to vector<1x256xf32>
    %10 = vector.extract_strided_slice %7 {offsets = [2, 0], sizes = [1, 256], strides = [1, 1]} : vector<4x256xf32> to vector<1x256xf32>
    %11 = vector.extract_strided_slice %7 {offsets = [3, 0], sizes = [1, 256], strides = [1, 1]} : vector<4x256xf32> to vector<1x256xf32>
    %c16_i32 = arith.constant 16 : i32
    %12 = tpu.dynamic_rotate %6 by %c16_i32 dim 1 : vector<8x256xf32>, i32 -> vector<8x256xf32>
    %13 = vector.broadcast %10 : vector<1x256xf32> to vector<8x256xf32>
    %14 = arith.mulf %12, %13 : vector<8x256xf32>
    %c240_i32 = arith.constant 240 : i32
    %15 = tpu.dynamic_rotate %6 by %c240_i32 dim 1 : vector<8x256xf32>, i32 -> vector<8x256xf32>
    %16 = vector.broadcast %11 : vector<1x256xf32> to vector<8x256xf32>
    %17 = arith.mulf %15, %16 : vector<8x256xf32>
    %c0_8 = arith.constant 0 : index
    %c0_9 = arith.constant 0 : index
    %18 = vector.load %arg6[%c0_8, %c0_9] : memref<8x9xf32, #tpu.memory_space<vmem>>, vector<8x9xf32>
    %c1_i32 = arith.constant 1 : i32
    %19 = tpu.dynamic_rotate %14 by %c1_i32 dim 1 : vector<8x256xf32>, i32 -> vector<8x256xf32>
    %20 = vector.broadcast %8 : vector<1x256xf32> to vector<8x256xf32>
    %21 = arith.mulf %19, %20 : vector<8x256xf32>
    %c255_i32 = arith.constant 255 : i32
    %22 = tpu.dynamic_rotate %14 by %c255_i32 dim 1 : vector<8x256xf32>, i32 -> vector<8x256xf32>
    %23 = vector.broadcast %9 : vector<1x256xf32> to vector<8x256xf32>
    %24 = arith.mulf %22, %23 : vector<8x256xf32>
    %25 = vector.extract_strided_slice %18 {offsets = [0, 0], sizes = [8, 1], strides = [1, 1]} : vector<8x9xf32> to vector<8x1xf32>
    %26 = vector.broadcast %25 : vector<8x1xf32> to vector<8x256xf32>
    %27 = arith.mulf %21, %26 : vector<8x256xf32>
    %28 = vector.extract_strided_slice %18 {offsets = [0, 1], sizes = [8, 1], strides = [1, 1]} : vector<8x9xf32> to vector<8x1xf32>
    %29 = vector.broadcast %28 : vector<8x1xf32> to vector<8x256xf32>
    %30 = arith.mulf %14, %29 : vector<8x256xf32>
    %31 = arith.addf %27, %30 : vector<8x256xf32>
    %32 = vector.extract_strided_slice %18 {offsets = [0, 2], sizes = [8, 1], strides = [1, 1]} : vector<8x9xf32> to vector<8x1xf32>
    %33 = vector.broadcast %32 : vector<8x1xf32> to vector<8x256xf32>
    %34 = arith.mulf %24, %33 : vector<8x256xf32>
    %35 = arith.addf %31, %34 : vector<8x256xf32>
    %c1_i32_10 = arith.constant 1 : i32
    %36 = tpu.dynamic_rotate %6 by %c1_i32_10 dim 1 : vector<8x256xf32>, i32 -> vector<8x256xf32>
    %37 = vector.broadcast %8 : vector<1x256xf32> to vector<8x256xf32>
    %38 = arith.mulf %36, %37 : vector<8x256xf32>
    %c255_i32_11 = arith.constant 255 : i32
    %39 = tpu.dynamic_rotate %6 by %c255_i32_11 dim 1 : vector<8x256xf32>, i32 -> vector<8x256xf32>
    %40 = vector.broadcast %9 : vector<1x256xf32> to vector<8x256xf32>
    %41 = arith.mulf %39, %40 : vector<8x256xf32>
    %42 = vector.extract_strided_slice %18 {offsets = [0, 3], sizes = [8, 1], strides = [1, 1]} : vector<8x9xf32> to vector<8x1xf32>
    %43 = vector.broadcast %42 : vector<8x1xf32> to vector<8x256xf32>
    %44 = arith.mulf %38, %43 : vector<8x256xf32>
    %45 = vector.extract_strided_slice %18 {offsets = [0, 4], sizes = [8, 1], strides = [1, 1]} : vector<8x9xf32> to vector<8x1xf32>
    %46 = vector.broadcast %45 : vector<8x1xf32> to vector<8x256xf32>
    %47 = arith.mulf %6, %46 : vector<8x256xf32>
    %48 = arith.addf %44, %47 : vector<8x256xf32>
    %49 = vector.extract_strided_slice %18 {offsets = [0, 5], sizes = [8, 1], strides = [1, 1]} : vector<8x9xf32> to vector<8x1xf32>
    %50 = vector.broadcast %49 : vector<8x1xf32> to vector<8x256xf32>
    %51 = arith.mulf %41, %50 : vector<8x256xf32>
    %52 = arith.addf %48, %51 : vector<8x256xf32>
    %53 = arith.addf %35, %52 : vector<8x256xf32>
    %c1_i32_12 = arith.constant 1 : i32
    %54 = tpu.dynamic_rotate %17 by %c1_i32_12 dim 1 : vector<8x256xf32>, i32 -> vector<8x256xf32>
    %55 = vector.broadcast %8 : vector<1x256xf32> to vector<8x256xf32>
    %56 = arith.mulf %54, %55 : vector<8x256xf32>
    %c255_i32_13 = arith.constant 255 : i32
    %57 = tpu.dynamic_rotate %17 by %c255_i32_13 dim 1 : vector<8x256xf32>, i32 -> vector<8x256xf32>
    %58 = vector.broadcast %9 : vector<1x256xf32> to vector<8x256xf32>
    %59 = arith.mulf %57, %58 : vector<8x256xf32>
    %60 = vector.extract_strided_slice %18 {offsets = [0, 6], sizes = [8, 1], strides = [1, 1]} : vector<8x9xf32> to vector<8x1xf32>
    %61 = vector.broadcast %60 : vector<8x1xf32> to vector<8x256xf32>
    %62 = arith.mulf %56, %61 : vector<8x256xf32>
    %63 = vector.extract_strided_slice %18 {offsets = [0, 7], sizes = [8, 1], strides = [1, 1]} : vector<8x9xf32> to vector<8x1xf32>
    %64 = vector.broadcast %63 : vector<8x1xf32> to vector<8x256xf32>
    %65 = arith.mulf %17, %64 : vector<8x256xf32>
    %66 = arith.addf %62, %65 : vector<8x256xf32>
    %67 = vector.extract_strided_slice %18 {offsets = [0, 8], sizes = [8, 1], strides = [1, 1]} : vector<8x9xf32> to vector<8x1xf32>
    %68 = vector.broadcast %67 : vector<8x1xf32> to vector<8x256xf32>
    %69 = arith.mulf %59, %68 : vector<8x256xf32>
    %70 = arith.addf %66, %69 : vector<8x256xf32>
    %71 = arith.addf %53, %70 : vector<8x256xf32>
    %c0_14 = arith.constant 0 : index
    %c0_15 = arith.constant 0 : index
    %72 = vector.load %arg7[%c0_14, %c0_15] : memref<8x1xf32, #tpu.memory_space<vmem>>, vector<8x1xf32>
    %73 = vector.broadcast %72 : vector<8x1xf32> to vector<8x256xf32>
    %74 = arith.addf %71, %73 : vector<8x256xf32>
    %cst_16 = arith.constant 5.000000e-01 : f32
    %75 = vector.broadcast %cst_16 : f32 to vector<8x256xf32>
    %76 = arith.mulf %75, %74 : vector<8x256xf32>
    %cst_17 = arith.constant 0.707106769 : f32
    %77 = vector.broadcast %cst_17 : f32 to vector<8x256xf32>
    %78 = arith.mulf %74, %77 : vector<8x256xf32>
    %79 = math.erf %78 : vector<8x256xf32>
    %cst_18 = arith.constant 1.000000e+00 : f32
    %80 = vector.broadcast %cst_18 : f32 to vector<8x256xf32>
    %81 = arith.addf %80, %79 : vector<8x256xf32>
    %82 = arith.mulf %76, %81 : vector<8x256xf32>
    %c0_19 = arith.constant 0 : index
    %c0_20 = arith.constant 0 : index
    %83 = vector.load %arg8[%c0_19, %c0_20] : memref<4x8xbf16, #tpu.memory_space<vmem>>, vector<4x8xbf16>
    %84 = arith.truncf %82 : vector<8x256xf32> to vector<8x256xbf16>
    %cst_21 = arith.constant dense<0.000000e+00> : vector<4x256xf32>
    %85 = tpu.matmul %83, %84, %cst_21 {dimension_numbers = #tpu.dot_dimension_numbers<[1], [0], [0], [1], [0, 0, 1, 1], [], []>} : vector<4x8xbf16>, vector<8x256xbf16>, vector<4x256xf32> -> vector<4x256xf32>
    %c0_i32 = arith.constant 0 : i32
    %86 = arith.cmpi eq, %arg1, %c0_i32 : i32
    %87 = arith.extui %86 : i1 to i32
    %c0_i32_22 = arith.constant 0 : i32
    %88 = arith.cmpi ne, %87, %c0_i32_22 : i32
    scf.if %88 {
      %c0_27 = arith.constant 0 : index
      %c0_28 = arith.constant 0 : index
      %95 = vector.load %arg11[%c0_27, %c0_28] : memref<4x256xf32, #tpu.memory_space<vmem>>, vector<4x256xf32>
      tpu.vector_store %arg11[%c0_27, %c0_28], %85 {strides = array<i32>} : memref<4x256xf32, #tpu.memory_space<vmem>>, vector<4x256xf32>,
    } else {
    }
    %c0_i32_23 = arith.constant 0 : i32
    %89 = arith.cmpi sgt, %arg1, %c0_i32_23 : i32
    %90 = arith.extui %89 : i1 to i32
    %c0_i32_24 = arith.constant 0 : i32
    %91 = arith.cmpi ne, %90, %c0_i32_24 : i32
    scf.if %91 {
      %c0_27 = arith.constant 0 : index
      %c0_28 = arith.constant 0 : index
      %95 = vector.load %arg11[%c0_27, %c0_28] : memref<4x256xf32, #tpu.memory_space<vmem>>, vector<4x256xf32>
      %96 = arith.addf %95, %85 : vector<4x256xf32>
      %c0_29 = arith.constant 0 : index
      %c0_30 = arith.constant 0 : index
      %97 = vector.load %arg11[%c0_29, %c0_30] : memref<4x256xf32, #tpu.memory_space<vmem>>, vector<4x256xf32>
      tpu.vector_store %arg11[%c0_29, %c0_30], %96 {strides = array<i32>} : memref<4x256xf32, #tpu.memory_space<vmem>>, vector<4x256xf32>,
    } else {
    }
    %c0_i32_25 = arith.constant 0 : i32
    %92 = arith.cmpi eq, %arg1, %c0_i32_25 : i32
    %93 = arith.extui %92 : i1 to i32
    %c0_i32_26 = arith.constant 0 : i32
    %94 = arith.cmpi ne, %93, %c0_i32_26 : i32
    scf.if %94 {
      %c0_27 = arith.constant 0 : index
      %c0_28 = arith.constant 0 : index
      %95 = vector.load %arg11[%c0_27, %c0_28] : memref<4x256xf32, #tpu.memory_space<vmem>>, vector<4x256xf32>
      %c0_29 = arith.constant 0 : index
      %c0_30 = arith.constant 0 : index
      %96 = vector.load %arg9[%c0_29, %c0_30] : memref<4x1xf32, #tpu.memory_space<vmem>>, vector<4x1xf32>
      %97 = vector.broadcast %96 : vector<4x1xf32> to vector<4x256xf32>
      %98 = arith.addf %95, %97 : vector<4x256xf32>
      %99 = arith.truncf %98 : vector<4x256xf32> to vector<4x256xbf16>
      %c0_31 = arith.constant 0 : index
      %c0_32 = arith.constant 0 : index
      %c0_33 = arith.constant 0 : index
      %100 = vector.load %arg10[%c0_31, %c0_32, %c0_33] : memref<1x4x256xbf16, #tpu.memory_space<vmem>>, vector<1x4x256xbf16>
      %101 = vector.shape_cast %100 : vector<1x4x256xbf16> to vector<4x256xbf16>
      %102 = vector.shape_cast %99 : vector<4x256xbf16> to vector<1x4x256xbf16>
      tpu.vector_store %arg10[%c0_31, %c0_32, %c0_33], %102 {strides = array<i32>} : memref<1x4x256xbf16, #tpu.memory_space<vmem>>, vector<1x4x256xbf16>,
    } else {
    }
    return
  }
  func.func @transform_0(%arg0: i32, %arg1: i32) -> (i32, i32, i32) {
    %c0_i32 = arith.constant 0 : i32
    %c0_i32_0 = arith.constant 0 : i32
    %c0_i32_1 = arith.constant 0 : i32
    return %arg0, %c0_i32, %c0_i32_0 : i32, i32, i32
  }
  func.func @transform_1(%arg0: i32, %arg1: i32) -> (i32, i32) {
    %c0_i32 = arith.constant 0 : i32
    %c0_i32_0 = arith.constant 0 : i32
    %c0_i32_1 = arith.constant 0 : i32
    return %c0_i32, %c0_i32_0 : i32, i32
  }
  func.func @transform_2(%arg0: i32, %arg1: i32) -> (i32, i32) {
    %c0_i32 = arith.constant 0 : i32
    %c0_i32_0 = arith.constant 0 : i32
    return %arg1, %c0_i32 : i32, i32
  }
  func.func @transform_3(%arg0: i32, %arg1: i32) -> (i32, i32) {
    %c0_i32 = arith.constant 0 : i32
    %c0_i32_0 = arith.constant 0 : i32
    return %arg1, %c0_i32 : i32, i32
  }
  func.func @transform_4(%arg0: i32, %arg1: i32) -> (i32, i32) {
    %c0_i32 = arith.constant 0 : i32
    %c0_i32_0 = arith.constant 0 : i32
    return %arg1, %c0_i32 : i32, i32
  }
  func.func @transform_5(%arg0: i32, %arg1: i32) -> (i32, i32) {
    %c0_i32 = arith.constant 0 : i32
    %c0_i32_0 = arith.constant 0 : i32
    return %arg1, %c0_i32 : i32, i32
  }
  func.func @transform_6(%arg0: i32, %arg1: i32) -> (i32, i32) {
    %c0_i32 = arith.constant 0 : i32
    %c0_i32_0 = arith.constant 0 : i32
    return %c0_i32, %arg1 : i32, i32
  }
  func.func @transform_7(%arg0: i32, %arg1: i32) -> (i32, i32) {
    %c0_i32 = arith.constant 0 : i32
    %c0_i32_0 = arith.constant 0 : i32
    %c0_i32_1 = arith.constant 0 : i32
    return %c0_i32, %c0_i32_0 : i32, i32
  }
  func.func @transform_8(%arg0: i32, %arg1: i32) -> (i32, i32, i32) {
    %c0_i32 = arith.constant 0 : i32
    %c0_i32_0 = arith.constant 0 : i32
    %c0_i32_1 = arith.constant 0 : i32
    return %arg0, %c0_i32, %c0_i32_0 : i32, i32, i32
  }
}

</mosaic_0001>

<bundles_post_ra>
// kernel: _strip_mlp_flat.1
= control target key start
LH: loop header
LB: loop body
LE: loop exit
PB: predicated region body
PF: predicated region fallthrough
CT: control target
= control target key end

     0   :  { %13 = vsyncpa [#allocation4], 0  ;;  %s1460_s0 = inlined_call_operand.vmem [shape: bf16[2,4,256], index: 0, kind: input, shape index: {}]   ;;  %s1461_s1 = inlined_call_operand.vmem [shape: f32[4,256], index: 1, kind: input, shape index: {}]   ;;  %s1462_s2 = inlined_call_operand.vmem [shape: bf16[8,4], index: 2, kind: input, shape index: {}]   ;;  %s1463_s3 = inlined_call_operand.vmem [shape: f32[8,1], index: 3, kind: input, shape index: {}]   ;;  %s1464_s4 = inlined_call_operand.vmem [shape: f32[8,9], index: 4, kind: input, shape index: {}]   ;;  %s1465_s5 = inlined_call_operand.vmem [shape: f32[8,1], index: 5, kind: input, shape index: {}]   ;;  %s1466_s6 = inlined_call_operand.vmem [shape: bf16[4,8], index: 6, kind: input, shape index: {}]   ;;  %s1467_s7 = inlined_call_operand.vmem [shape: f32[4,1], index: 7, kind: input, shape index: {}]   ;;  %s1468_s8 = inlined_call_operand.hbm [shape: bf16[2,4,256], index: 8, kind: output, shape index: {}]  }
   0x1   :  { %15 = vsyncpa [#allocation4 + $0x1], 0  ;;  %s1213_s27 = smov 0   ;;  %s1215_s28 = smov 0  }
   0x2   :  { %s1217_s29 = smov 0   ;;  %s1219_s30 = smov 0  }
   0x3   :  { %s1221_s9 = smov 0   ;;  %s1223_s10 = smov 0  }
   0x4 LB: > { %s963_s11 = sadd.s32 4294967295, %s1152_s10   ;;  %s964_s12 = sadd.s32 4294967294, %s1152_s10   ;;  %s1152_s10 = sphi %s1223_s10, %s21_s10   ;;  %s1148_s9 = sphi %s1221_s9, %s1475_s9   ;;  %s1144_s30 = sphi %s1219_s30, %s1474_s30   ;;  %s1140_s29 = sphi %s1217_s29, %s1473_s29   ;;  %s1136_s28 = sphi %s1215_s28, %s1472_s28   ;;  %s1132_s27 = sphi %s1213_s27, %s1471_s27  }
   0x5   : > { %s33_s13 = sadd.s32 1, %s1148_s9  ;;  %s238_s14 = sadd.s32 1, %s1140_s29 }
   0x6   : > { %p35_p0 = scmp.ge.s32.totalorder %s33_s13, 2  ;;  %p248_p1 = scmp.ne.s32.totalorder %s1140_s29, %s1136_s28 }
   0x7   : > { %p249_p2 = scmp.eq.s32.totalorder %s963_s11, 1  ;;  %p254_p3 = scmp.ne.s32.totalorder %s1136_s28, %s1132_s27 }
   0x8   : > { %s1477_s13 = smov (%p35_p0, %s33_s13), 0  ;;  %p255_p5 = scmp.eq.s32.totalorder %s964_s12, 1 }
   0x9   : > { %p1253_p4 = por %p249_p2, %p248_p1  ;;  %s235_s16 = ssub.s32 %s1148_s9, %s1477_s13 }
   0xa   : > { %p972_p6 = scmp.ge.s32.totalorder %s1152_s10, 1  ;;  %p236_p7 = scmp.eq.s32.totalorder %s235_s16, 0 }
   0xb   : > { %p1260_p8 = por %p255_p5, %p254_p3  ;;  %p322_p9 = scmp.lt.s32.totalorder %s1152_s10, 3 }
   0xc   : > { %s1266_s18 = scalar_select %p236_p7, %s1140_s29, %s238_s14  }
   0xd   : > { %p323_p10 = pnand %p972_p6, %p322_p9 }
   0xe   : > { %p376_p11 = scmp.lt.s32.totalorder (!%p323_p10), %s1144_s30, 1  ;;  %s1160_s16 = smov (!%p323_p10), 112  }
   0xf   : > { %326 = sbr.rel (%p323_p10) target bundleno = 645 (0x285), region = 52  ;;  %s1161_s19 = smov (!%p323_p10), 16  }
  0x10   : > { %s1162_s20 = smov (!%p323_p10), 1  }
  0x14   : > { %v1154_v0 = vmov 0   ;;  %v404_v1 = vld [vmem:[%s1463_s3] sm:$0xff]  ;;  %s377_s21 = scalar_select %p376_p11, %s1144_s30, 1  ;;  %v1155_v3 = vmov 3   ;;  %vm418_vm0 = vcmask 1041408   ;;  %vm414_vm1 = vcmask 31744  }
  0x15   : > { %1058 = vset.pattern.permute.xlu0 %v1154_v0  ;;  %v1277_v2 = vld [vmem:[%s1464_s4] sm:$0xff]  ;;  %1060 = vset.pattern.permute.xlu2 %v1155_v3  ;;  %v1156_v10 = vmov 1   ;;  %v1157_v11 = vmov 5   ;;  %v1158_v12 = vmov 4   ;;  %v1159_v13 = vmov 2  }
  0x16   : > { %407 = vperm.xlu0 %1058, %v404_v1   ;;  %554 = vperm.xlu2 %1060, %v1277_v2   ;;  %s987_s24 = sshll.u32 %s377_s21, 2  ;;  %v403_v9 = vld [vmem:[%s1462_s2] sm:$0xf]  ;;  %s1163_s21 = smov 127   ;;  %v1164_v23 = vmov 6   ;;  %v454_v25 = vlaneseq  ;;  %v1165_v32 = vmov 7  }
  0x17   : > { %s380_s11 = scalar_lea.vmem %s1460_s0, %s987_s24  ;;  %1059 = vset.pattern.permute.xlu1 %v1156_v10  ;;  %v449_v26 = vld [vmem:[%s1461_s1] sm:$0xff]  ;;  %v1166_v48 = vmov 8   ;;  %vm720_vm14 = vcmask 1043456   ;;  %vm716_vm15 = vcmask 64512  }
  0x18   : > { %v402_v4 = vld [vmem:[%s380_s11] sm:$0xf]  ;;  %522 = vperm.xlu1 %1059, %v1277_v2   ;;  %v1316_v28 = vand.u32 127, %v454_v25  ;;  %v460_v29 = vperm.slane %v449_v26, 2  ;;  %v461_v30 = vperm.slane %v449_v26, 6  ;;  %v475_v39 = vperm.slane %v449_v26, 3 }
  0x19   : > { %411 = vst [vmem:[#allocation1] ss:$4 sm:$0xff] %v402_v4  ;;  %v476_v40 = vperm.slane %v449_v26, 7  ;;  %v506_v55 = vperm.slane %v449_v26, 1  ;;  %v507_v56 = vperm.slane %v449_v26, 5  ;;  %v491_v1 = vperm.slane %v449_v26, 0 }
  0x1a   : > { %vm456_vm2 = vcmp.lt.s32.totalorder %v1316_v28, 16  ;;  %v464_v33 = vperm.slane %v460_v29, 2  ;;  %v465_v34 = vperm.slane %v461_v30, 2  ;;  %vm472_vm3 = vcmp.lt.s32.totalorder %v1316_v28, 112 }
  0x1b   : > { %v479_v45 = vperm.slane %v475_v39, 3  ;;  %v480_v46 = vperm.slane %v476_v40, 3  ;;  %vm503_vm4 = vcmp.lt.s32.totalorder %v1316_v28, 127  ;;  %v1337_v57 = vperm.slane %v506_v55, 1 }
  0x1c   : > { %v1339_v58 = vperm.slane %v507_v56, 1  ;;  %v492_v3 = vperm.slane %v449_v26, 4  ;;  %vm488_vm5 = vcmp.lt.s32.totalorder %v1316_v28, 1 }
  0x1e   : > { %516 = vperm.xlu0 %1058, %v1277_v2   ;;  %1063 = vset.pattern.permute.xlu2 %v1157_v11 }
  0x1f   : > { %568 = vperm.xlu2 %1063, %v1277_v2  }
  0x20   : > { %v412_v5 = vld.sshfl [vmem:[#allocation1] sm:$0xff pattern:$0x73625140]  ;;  %v413_v6 = vld.sshfl [vmem:[#allocation1 + $0x8] sm:$0xff pattern:$0x73625140]  ;;  %1062 = vset.pattern.permute.xlu1 %v1159_v13 }
  0x21   : > { %v419_v7 = vsel %vm418_vm0, %v412_v5, 0  ;;  %v421_v8 = vsel %vm418_vm0, %v413_v6, 0 }
  0x22   : > { %430 = vmatpush.bf16.msra.mxu0 %v419_v7  ;;  %443 = vmatpush.bf16.msra.mxu1 %v421_v8  ;;  %v495_v8 = vperm.slane %v491_v1, 0 }
  0x25   : > { %976 = vmatmul.msk.bf16.vlgmr.msra.gmra.mxu0 %vm414_vm1, %v403_v9  ;;  %977 = vmatmul.msk.bf16.vlgmr.msra.gmra.mxu1 %vm414_vm1, %v403_v9  ;;  %v496_v9 = vperm.slane %v492_v3, 0 }
  0x26   : > { %1061 = vset.pattern.permute.xlu0 %v1158_v12 }
  0x27   : > { %1066 = vset.pattern.permute.xlu2 %v1166_v48 }
  0x70   : > { %v1309_v21 = vpop.permute.xlu2 %554 }
  0x79   : > { %v569_v22 = vpop.permute.xlu2 %568 }
  0x88   : > { %v408_v14 = vpop.permute.xlu0 %407 }
  0x8a   : > { %v523_v24 = vpop.permute.xlu1 %522 }
  0x90   : > { %v1314_v27 = vpop.permute.xlu0 %516 }
  0xa2   : > { %v432_v15 = vpop.f32.mrf.mxu0  ;;  %v445_v16 = vpop.f32.mrf.mxu1 }
  0xa3   : > { %v1291_v17 = vadd.f32 %v432_v15, %v408_v14  ;;  %v1293_v18 = vadd.f32 %v445_v16, %v408_v14 }
  0xa5   : > { %470 = vrot.lane.b32.xlu2 %v1293_v18, %s1160_s16  ;;  %452 = vrot.lane.b32.xlu1 %v1293_v18, %s1161_s19 }
  0xa6   : > { %450 = vrot.lane.b32.xlu0 %v1291_v17, %s1161_s19 }
  0xaa   : > { %v434_v19 = vpop.f32.mrf.mxu0  ;;  %v447_v20 = vpop.f32.mrf.mxu1 }
  0xad   : > { %539 = vrot.lane.b32.xlu2 %v1293_v18, %s1162_s20  ;;  %468 = vrot.lane.b32.xlu1 %v1291_v17, %s1160_s16  ;;  %s373_s16 = sand.u32 1, %s1136_s28  }
  0xae   : > { %560 = vperm.xlu0 %1061, %v1277_v2   ;;  %s973_s19 = sshll.u32 %s373_s16, 2  ;;  %s805_s11 = scalar_lea.sflag [#allocation4], %s373_s16 }
  0xaf   : > { %s375_s24 = scalar_lea.vmem [#allocation3], %s973_s19  ;;  %s1094_s19 = scalar_lea.hbm %s1468_s8, 8 }
  0xb0   : > { %s818_s25 = sshll.u32 %s375_s24, 4  ;;  %s819_s25 = int_to_ptr.vmem [resolvable:$true] %s818_s25 }
  0xb5   : > { %545 = vrot.lane.b32.xlu2 %v1291_v17, %s1163_s21  ;;  %530 = vperm.xlu1 %1062, %v1277_v2  }
  0xb6   : > { %547 = vrot.lane.b32.xlu0 %v1293_v18, %s1163_s21 }
  0xb7   : > { %1064 = vset.pattern.permute.xlu0 %v1164_v23 }
  0xbd   : > { %537 = vrot.lane.b32.xlu1 %v1291_v17, %s1162_s20 }
  0xbe   : > { %1065 = vset.pattern.permute.xlu1 %v1165_v32 }
  0xff   : > { %v471_v31 = vpop.permute.xlu2 %470 }
 0x107   : > { %v540_v47 = vpop.permute.xlu2 %539 }
 0x10f   : > { %v546_v60 = vpop.permute.xlu2 %545 }
 0x117   : > { %v453_v35 = vpop.permute.xlu1 %452 }
 0x118   : > { %v451_v36 = vpop.permute.xlu0 %450 }
 0x119   : > { %v457_v37 = vsel %vm456_vm2, %v451_v36, %v453_v35  ;;  %v458_v38 = vsel %vm456_vm2, %v453_v35, %v451_v36 }
 0x11a   : > { %v466_v41 = vmul.f32 %v464_v33, %v458_v38  ;;  %v467_v42 = vmul.f32 %v465_v34, %v457_v37 }
 0x11c   : > { %v1319_v43 = vmul.f32 %v523_v24, %v466_v41  ;;  %v1321_v44 = vmul.f32 %v523_v24, %v467_v42  ;;  %484 = vrot.lane.b32.xlu2 %v466_v41, %s1162_s20  ;;  %501 = vrot.lane.b32.xlu1 %v467_v42, %s1163_s21 }
 0x11d   : > { %486 = vrot.lane.b32.xlu0 %v467_v42, %s1162_s20 }
 0x11f   : > { %v469_v49 = vpop.permute.xlu1 %468 }
 0x120   : > { %v473_v50 = vsel %vm472_vm3, %v469_v49, %v471_v31  ;;  %v474_v51 = vsel %vm472_vm3, %v471_v31, %v469_v49  ;;  %v561_v52 = vpop.permute.xlu0 %560 }
 0x121   : > { %v1327_v53 = vmul.f32 %v479_v45, %v473_v50  ;;  %v1329_v54 = vmul.f32 %v480_v46, %v474_v51  ;;  %v563_v15 = vmul.f32 %v561_v52, %v1291_v17  ;;  %v564_v16 = vmul.f32 %v561_v52, %v1293_v18  ;;  %v617_v17 = vld [vmem:[%s1465_s5] sm:$0xff] }
 0x124   : > { %579 = vrot.lane.b32.xlu2 %v1329_v54, %s1162_s20  ;;  %577 = vrot.lane.b32.xlu1 %v1327_v53, %s1162_s20  ;;  %s988_s20 = sshll.u32 %s1144_s30, 2 }
 0x125   : > { %499 = vrot.lane.b32.xlu0 %v466_v41, %s1163_s21  ;;  %s816_s23 = scalar_lea.hbm %s1468_s8, %s988_s20 }
 0x126   : > { %s820_s26 = sshll.u32 %s816_s23, 4  ;;  %s821_s26 = int_to_ptr.hbm [resolvable:$true] %s820_s26 }
 0x127   : > { %v531_v59 = vpop.permute.xlu1 %530  ;;  %s1088_s12 = sshra.s32 %s821_s26, 4  ;;  %s1089_s12 = int_to_ptr.hbm [resolvable:$true] %s1088_s12 }
 0x128   : > { %v548_v61 = vpop.permute.xlu0 %547  ;;  %s1090_s30 = scalar_lea.hbm %s1089_s12, 4  ;;  %p1095_p1 = scmp.lt.s32.totalorder %s1089_s12, %s1468_s8 }
 0x129   : > { %v549_v62 = vsel %vm503_vm4, %v546_v60, %v548_v61  ;;  %v550_v63 = vsel %vm503_vm4, %v548_v61, %v546_v60  ;;  %p1091_p12 = scmp.ne.s32.totalorder %s1089_s12, %s1090_s30  ;;  %p1096_p2 = scmp.lt.s32.totalorder %s1094_s19, %s1090_s30 }
 0x12a   : > { %v551_v4 = vmul.f32 %v549_v62, %v1337_v57  ;;  %v552_v5 = vmul.f32 %v550_v63, %v1339_v58 }
 0x12b   : > { %p1092_p13 = pnand %p1091_p12, %p1253_p4  ;;  %p1097_p3 = por %p1096_p2, %p1095_p1 }
 0x12c   : > { %v571_v6 = vmul.f32 %v569_v22, %v551_v4  ;;  %v572_v7 = vmul.f32 %v569_v22, %v552_v5  ;;  %587 = vrot.lane.b32.xlu2 %v1329_v54, %s1163_s21  ;;  %585 = vrot.lane.b32.xlu1 %v1327_v53, %s1163_s21 }
 0x12d   : > { %594 = vperm.xlu0 %1064, %v1277_v2   ;;  %p1093_p0 = pneg %p1092_p13 }
 0x12f   : > { %v538_v10 = vpop.permute.xlu1 %537  ;;  %p1098_p5 = pnand %p1097_p3, %p1093_p0 }
 0x130   : > { %v541_v11 = vsel %vm488_vm5, %v538_v10, %v540_v47  ;;  %v542_v12 = vsel %vm488_vm5, %v540_v47, %v538_v10 }
 0x131   : > { %v543_v13 = vmul.f32 %v542_v12, %v495_v8  ;;  %v544_v14 = vmul.f32 %v541_v11, %v496_v9 }
 0x133   : > { %v557_v19 = vmul.f32 %v1309_v21, %v543_v13  ;;  %v558_v20 = vmul.f32 %v1309_v21, %v544_v14 }
 0x134   : > { %600 = vperm.xlu1 %1065, %v1277_v2   ;;  %608 = vperm.xlu2 %1066, %v1277_v2  }
 0x135   : > { %v565_v22 = vadd.f32 %v563_v15, %v557_v19  ;;  %v566_v23 = vadd.f32 %v564_v16, %v558_v20  ;;  %1069 = vset.pattern.permute.xlu0 %v1154_v0 }
 0x137   : > { %v573_v24 = vadd.f32 %v571_v6, %v565_v22  ;;  %v574_v25 = vadd.f32 %v572_v7, %v566_v23 }
 0x13c   : > { %1067 = vset.pattern.permute.xlu1 %v1154_v0  ;;  %1068 = vset.pattern.permute.xlu2 %v1154_v0 }
 0x13d   : > { %620 = vperm.xlu1 %1067, %v617_v17  }
 0x176   : > { %v485_v18 = vpop.permute.xlu2 %484 }
 0x17e   : > { %v580_v34 = vpop.permute.xlu2 %579 }
 0x186   : > { %v588_v49 = vpop.permute.xlu2 %587 }
 0x18e   : > { %v502_v21 = vpop.permute.xlu1 %501  ;;  %v609_v63 = vpop.permute.xlu2 %608 }
 0x18f   : > { %v487_v26 = vpop.permute.xlu0 %486 }
 0x190   : > { %v489_v2 = vsel %vm488_vm5, %v485_v18, %v487_v26  ;;  %v490_v29 = vsel %vm488_vm5, %v487_v26, %v485_v18 }
 0x191   : > { %v497_v30 = vmul.f32 %v495_v8, %v490_v29  ;;  %v498_v31 = vmul.f32 %v496_v9, %v489_v2 }
 0x193   : > { %v519_v32 = vmul.f32 %v1314_v27, %v497_v30  ;;  %v520_v33 = vmul.f32 %v1314_v27, %v498_v31 }
 0x195   : > { %v527_v35 = vadd.f32 %v1319_v43, %v519_v32  ;;  %v528_v0 = vadd.f32 %v1321_v44, %v520_v33 }
 0x196   : > { %v578_v36 = vpop.permute.xlu1 %577 }
 0x197   : > { %v581_v37 = vsel %vm488_vm5, %v578_v36, %v580_v34  ;;  %v582_v38 = vsel %vm488_vm5, %v580_v34, %v578_v36  ;;  %v500_v39 = vpop.permute.xlu0 %499 }
 0x198   : > { %v504_v40 = vsel %vm503_vm4, %v500_v39, %v502_v21  ;;  %v505_v41 = vsel %vm503_vm4, %v502_v21, %v500_v39  ;;  %v583_v27 = vmul.f32 %v582_v38, %v495_v8  ;;  %v584_v42 = vmul.f32 %v581_v37, %v496_v9 }
 0x199   : > { %v512_v43 = vmul.f32 %v1337_v57, %v504_v40  ;;  %v513_v44 = vmul.f32 %v1339_v58, %v505_v41 }
 0x19b   : > { %v533_v45 = vmul.f32 %v531_v59, %v512_v43  ;;  %v534_v46 = vmul.f32 %v531_v59, %v513_v44 }
 0x19d   : > { %v535_v47 = vadd.f32 %v533_v45, %v527_v35  ;;  %v536_v48 = vadd.f32 %v534_v46, %v528_v0 }
 0x19e   : > { %v586_v50 = vpop.permute.xlu1 %585 }
 0x19f   : > { %v589_v51 = vsel %vm503_vm4, %v586_v50, %v588_v49  ;;  %v590_v52 = vsel %vm503_vm4, %v588_v49, %v586_v50  ;;  %v575_v55 = vadd.f32 %v573_v24, %v535_v47  ;;  %v576_v56 = vadd.f32 %v574_v25, %v536_v48  ;;  %v595_v62 = vpop.permute.xlu0 %594 }
 0x1a0   : > { %v591_v60 = vmul.f32 %v589_v51, %v1337_v57  ;;  %v592_v61 = vmul.f32 %v590_v52, %v1339_v58  ;;  %v597_v59 = vmul.f32 %v595_v62, %v583_v27  ;;  %v598_v3 = vmul.f32 %v595_v62, %v584_v42  ;;  %v779_v51 = vld [vmem:[%s1467_s7] sm:$0xf] }
 0x1a1   : > { %782 = vperm.xlu2 %1068, %v779_v51  }
 0x1a2   : > { %v611_v6 = vmul.f32 %v609_v63, %v591_v60  ;;  %v612_v7 = vmul.f32 %v609_v63, %v592_v61 }
 0x1a6   : > { %v601_v1 = vpop.permute.xlu1 %600 }
 0x1a7   : > { %v603_v4 = vmul.f32 %v601_v1, %v1327_v53  ;;  %v604_v5 = vmul.f32 %v601_v1, %v1329_v54 }
 0x1a9   : > { %v605_v8 = vadd.f32 %v603_v4, %v597_v59  ;;  %v606_v28 = vadd.f32 %v604_v5, %v598_v3 }
 0x1ab   : > { %v613_v9 = vadd.f32 %v611_v6, %v605_v8  ;;  %v614_v10 = vadd.f32 %v612_v7, %v606_v28 }
 0x1ad   : > { %v615_v11 = vadd.f32 %v613_v9, %v575_v55  ;;  %v616_v12 = vadd.f32 %v614_v10, %v576_v56 }
 0x1af   : > { %v621_v57 = vpop.permute.xlu1 %620 }
 0x1b0   : > { %v1395_v13 = vadd.f32 %v621_v57, %v615_v11  ;;  %v1397_v58 = vadd.f32 %v621_v57, %v616_v12 }
 0x1b2   : > { %v1400_v14 = vmul.f32 0.70710677, %v1395_v13  ;;  %v1403_v53 = vmul.f32 0.70710677, %v1397_v58 }
 0x1b4   : > { %v629_v54 = vmul.f32 %v1400_v14, %v1400_v14  ;;  %v669_v15 = vmul.f32 %v1403_v53, %v1403_v53 }
 0x1b6   : > { %v630_v16 = vmin.f32 %v629_v54, 16.0  ;;  %v670_v19 = vmin.f32 %v669_v15, 16.0 }
 0x1b8   : > { %v631_v20 = vmul.f32 2.1237322e-06, %v630_v16  ;;  %v671_v22 = vmul.f32 2.1237322e-06, %v670_v19  ;;  %v642_v23 = vmul.f32 3.8918573e-05, %v630_v16 }
 0x1b9   : > { %v682_v24 = vmul.f32 3.8918573e-05, %v670_v19 }
 0x1ba   : > { %v632_v25 = vadd.f32 0.00028619796, %v631_v20  ;;  %v672_v17 = vadd.f32 0.00028619796, %v671_v22  ;;  %v643_v18 = vadd.f32 0.001143296, %v642_v23 }
 0x1bb   : > { %v683_v21 = vadd.f32 0.001143296, %v682_v24 }
 0x1bc   : > { %v633_v26 = vmul.f32 %v632_v25, %v630_v16  ;;  %v673_v2 = vmul.f32 %v672_v17, %v670_v19  ;;  %v644_v29 = vmul.f32 %v643_v18, %v630_v16 }
 0x1bd   : > { %v684_v30 = vmul.f32 %v683_v21, %v670_v19  ;;  %v625_v21 = vmul.f32 0.5, %v1395_v13  ;;  %v1167_v13 = vmov 839922192  }
 0x1be   : > { %v634_v31 = vadd.f32 0.0036580483, %v633_v26  ;;  %v645_v32 = vadd.f32 0.014752088, %v644_v29  ;;  %v674_v34 = vadd.f32 0.0036580483, %v673_v2 }
 0x1bf   : > { %v685_v33 = vadd.f32 0.014752088, %v684_v30  ;;  %v626_v2 = vmul.f32 0.5, %v1397_v58  ;;  %v785_v58 = vunpack.c.l.s4 %v1167_v13 }
 0x1c0   : > { %v646_v35 = vmul.f32 %v645_v32, %v630_v16  ;;  %v635_v36 = vmul.f32 %v634_v31, %v630_v16  ;;  %v675_v39 = vmul.f32 %v674_v34, %v670_v19  ;;  %v713_v34 = vld [vmem:[%s1466_s6] sm:$0x3] }
 0x1c1   : > { %v686_v0 = vmul.f32 %v685_v33, %v670_v19 }
 0x1c2   : > { %v647_v37 = vadd.f32 0.112945676, %v646_v35  ;;  %v636_v27 = vadd.f32 0.05243302, %v635_v36  ;;  %v676_v44 = vadd.f32 0.05243302, %v675_v39  ;;  %v786_v35 = vunpack.c.0.s8 %v785_v58 }
 0x1c3   : > { %v687_v38 = vadd.f32 0.112945676, %v686_v0 }
 0x1c4   : > { %v648_v40 = vmul.f32 %v647_v37, %v630_v16  ;;  %v637_v47 = vmul.f32 %v636_v27, %v630_v16  ;;  %v677_v50 = vmul.f32 %v676_v44, %v670_v19 }
 0x1c5   : > { %v688_v41 = vmul.f32 %v687_v38, %v670_v19 }
 0x1c6   : > { %v649_v42 = vadd.f32 0.4994258, %v648_v40  ;;  %v638_v52 = vadd.f32 0.18741608, %v637_v47  ;;  %v678_v55 = vadd.f32 0.18741608, %v677_v50 }
 0x1c7   : > { %v689_v43 = vadd.f32 0.4994258, %v688_v41 }
 0x1c8   : > { %v650_v45 = vmul.f32 %v649_v42, %v630_v16  ;;  %v639_v60 = vmul.f32 %v638_v52, %v630_v16  ;;  %v679_v63 = vmul.f32 %v678_v55, %v670_v19 }
 0x1c9   : > { %v690_v46 = vmul.f32 %v689_v43, %v670_v19 }
 0x1ca   : > { %v651_v48 = vadd.f32 1.0, %v650_v45  ;;  %v640_v3 = vadd.f32 1.1283791, %v639_v60  ;;  %v680_v28 = vadd.f32 1.1283791, %v679_v63 }
 0x1cb   : > { %v691_v49 = vadd.f32 1.0, %v690_v46 }
 0x1cc   : > { %1070 = vrcp.f32 %v651_v48  ;;  %v663_v4 = vand.u32 2147483648, %v651_v48  ;;  %v661_v7 = vand.u32 2147483647, %v651_v48  ;;  %vm657_vm8 = vweird.f32 %v651_v48 }
 0x1cd   : > { %1072 = vrcp.f32 %v691_v49  ;;  %v703_v8 = vand.u32 2147483648, %v691_v49  ;;  %v701_v10 = vand.u32 2147483647, %v691_v49  ;;  %vm697_vm10 = vweird.f32 %v691_v49 }
 0x1ce   : > { %v664_v12 = vor.u32 1.1754944e-38, %v663_v4  ;;  %v641_v54 = vmul.f32 %v640_v3, %v1400_v14  ;;  %vm662_vm11 = vcmp.eq.f32.partialorder %v661_v7, 8.507059e+37  ;;  %v681_v19 = vmul.f32 %v680_v28, %v1403_v53 }
 0x1cf   : > { %v704_v16 = vor.u32 1.1754944e-38, %v703_v8  ;;  %vm702_vm13 = vcmp.eq.f32.partialorder %v701_v10, 8.507059e+37 }
 0x1d2   : > { %v1071_v56 = vpop.eup %1070 }
 0x1d3   : > { %v1073_v61 = vpop.eup %1072  ;;  %v653_v62 = vmul.f32 %v1071_v56, %v651_v48  ;;  %vm658_vm6 = vweird.f32 %v1071_v56 }
 0x1d4   : > { %v693_v1 = vmul.f32 %v1073_v61, %v691_v49  ;;  %vm698_vm7 = vweird.f32 %v1073_v61  ;;  %vm659_vm9 = vmor %vm657_vm8, %vm658_vm6 }
 0x1d5   : > { %v654_v59 = vsub.f32 1.0, %v653_v62  ;;  %vm699_vm12 = vmor %vm697_vm10, %vm698_vm7 }
 0x1d6   : > { %v694_v5 = vsub.f32 1.0, %v693_v1 }
 0x1d7   : > { %v655_v6 = vmul.f32 %v1071_v56, %v654_v59 }
 0x1d8   : > { %v695_v9 = vmul.f32 %v1073_v61, %v694_v5 }
 0x1d9   : > { %v656_v11 = vadd.f32 %v1071_v56, %v655_v6 }
 0x1da   : > { %v696_v57 = vadd.f32 %v1073_v61, %v695_v9 }
 0x1db   : > { %v660_v15 = vsel %vm659_vm9, %v1071_v56, %v656_v11 }
 0x1dc   : > { %v665_v20 = vsel %vm662_vm11, %v664_v12, %v660_v15  ;;  %v700_v22 = vsel %vm699_vm12, %v1073_v61, %v696_v57 }
 0x1dd   : > { %v666_v23 = vmul.f32 %v665_v20, %v641_v54  ;;  %v705_v24 = vsel %vm702_vm13, %v704_v16, %v700_v22 }
 0x1de   : > { %v706_v25 = vmul.f32 %v705_v24, %v681_v19 }
 0x1df   : > { %v978_v17 = vclamps-f32 %v666_v23, 1.0 }
 0x1e0   : > { %v979_v18 = vclamps-f32 %v706_v25, 1.0 }
 0x1e1   : > { %v709_v26 = vadd.f32 1.0, %v978_v17 }
 0x1e2   : > { %v710_v14 = vadd.f32 1.0, %v979_v18 }
 0x1e3   : > { %v711_v29 = vmul.f32 %v709_v26, %v625_v21 }
 0x1e4   : > { %v712_v30 = vmul.f32 %v710_v14, %v626_v2 }
 0x1e5   : > { %v714_v31 = vpack.c.bf16 %v711_v29, %v711_v29 }
 0x1e6   : > { %v715_v32 = vpack.c.bf16 %v712_v30, %v712_v30 }
 0x1e7   : > { %v722_v53 = vsel %vm720_vm14, %v714_v31, 0 }
 0x1e8   : > { %734 = vmatpush.bf16.msra.mxu2 %v722_v53  ;;  %v725_v33 = vsel %vm720_vm14, %v715_v32, 0 }
 0x1e9   : > { %747 = vmatpush.bf16.msra.mxu3 %v725_v33 }
 0x1eb   : > { %980 = vmatmul.msk.bf16.vlgmr.msra.gmra.mxu2 %vm716_vm15, %v713_v34 }
 0x1ec   : > { %981 = vmatmul.msk.bf16.vlgmr.msra.gmra.mxu3 %vm716_vm15, %v713_v34 }
 0x1fb   : > { %v783_v0 = vpop.permute.xlu2 %782 }
 0x1fc   : > { %v787_v38 = vperm.slane %v783_v0, %v786_v35 }
 0x26e   : > { %v736_v36 = vpop.f32.mrf.mxu2 }
 0x26f   : > { %v749_v37 = vpop.f32.mrf.mxu3 }
 0x270   : > { %v759_v39 = vrot.slane %v749_v37, 4 }
 0x272   : > { %v760_v40 = vsel %vm720_vm14, %v736_v36, %v759_v39 }
 0x273   : > { %v789_v41 = vadd.f32 %v787_v38, %v760_v40 }
 0x275   : > { %791 = vst [vmem:[#allocation1] ss:$2 sm:$0xff] %v789_v41 }
 0x276   : > { %v738_v27 = vpop.f32.mrf.mxu2 }
 0x277   : > { %v751_v42 = vpop.f32.mrf.mxu3 }
 0x27c   : > { %v792_v43 = vld.sshfl [vmem:[#allocation1] sm:$0xff pattern:$0x75316420]  ;;  %v793_v44 = vld.sshfl [vmem:[#allocation1 + $0x8] sm:$0xff pattern:$0x75316420] }
 0x27d   : > { %v796_v45 = vpack.c.bf16 %v793_v44, %v792_v43 }
 0x27f   : > { %v798_v46 = vrot.slane %v796_v45, 2 }
 0x281   : > { %v801_v47 = vsel %vm418_vm0, %v796_v45, %v798_v46 }
 0x282   : > { %803 = vst [vmem:[%s375_s24] sm:$0xf] %v801_v47 }
 0x283   : > { %1101 = shalt.err (!%p1098_p5)
}
 0x284   : > { %989 = dma.vmem_to_hbm [thread:$0]  (%p1253_p4), %s819_s25, 64, %s821_s26, %s805_s11  }
 0x285 PF: > { %p995_p6 = scmp.ge.s32.totalorder %s1152_s10, 2  ;;  %s832_s16 = sand.u32 1, %s1132_s27  }
 0x286   : > { %s833_s23 = scalar_lea.sflag [#allocation4], %s832_s16 }
 0x287   : > { %p992_p7 = pnand %p995_p6, %p1260_p8 }
 0x289   : > { %p993_p9 = pneg %p992_p7 }
 0x28b   : > { %1127 = dma.done.wait (%p993_p9), %s833_s23, 64  }
 0x28c   : > { %1129 = vsyncadd (%p993_p9), %s833_s23, 4294967232  ;;  %s21_s10 = sadd.s32 1, %s1152_s10   ;;  %s1471_s27 = smov %s1136_s28 }
 0x28d   : > { %p18_p10 = scmp.ge.s32.totalorder %s21_s10, 4   ;;  %s1472_s28 = smov %s1140_s29 }
 0x28e   : > { %s1473_s29 = smov %s1266_s18  ;;  %s1474_s30 = smov %s1148_s9 }
 0x28f   : > { %s1475_s9 = smov %s1477_s13  ;;  %20 = sbr.rel (!%p18_p10) target bundleno = 4 (0x4), region = 114 }
 0x294   :  { %839 = vsyncpa [#allocation4], 1 }
 0x295   :  { %841 = vsyncpa [#allocation4 + $0x1], 1 }

</bundles_post_ra>
